<compile_context>
chip_gen: v6e
topology: v6e:2x2x1
jax: 0.10.0
libtpu: 0.0.40
codegen_flags: <defaults>
</compile_context>

<pallas_src>
import functools
import math

import jax
import jax.numpy as jnp
from jax import lax
from jax.experimental import pallas as pl
from jax.experimental.pallas import tpu as pltpu


def _round_up(x, m):
    return ((x + m - 1) // m) * m


def _tile_and_pad(dim, candidates):
    """Return (padded_dim, tile).

    If a candidate divides `dim`, no padding is needed.  Small dims use a
    single full-extent block (legal per the (8,128) rule).  Large dims that
    are not a multiple of any candidate are zero-padded up to a multiple of
    the smallest candidate so the grid keeps >1 pipelined step instead of
    falling back to one giant block.
    """
    for c in candidates:
        if dim % c == 0:
            return dim, c
    smallest = candidates[-1]
    if dim <= smallest:
        return dim, dim
    return _round_up(dim, smallest), smallest


# ----------------------------------------------------------------------------
# Kernel 1: tiled dense layer  y = (x @ W^T + b) * scale   (torch Linear layout)
# ----------------------------------------------------------------------------
def _linear_kernel(x_ref, w_ref, b_ref, o_ref, acc_ref, *, scale):
    @pl.when(pl.program_id(2) == 0)
    def _():
        acc_ref[...] = jnp.zeros_like(acc_ref)

    # operands are pre-cast to bf16 in the wrapper; contract the last dims of
    # both (no in-kernel transpose of W), accumulate in f32.
    acc_ref[...] += lax.dot_general(
        x_ref[...], w_ref[...], (((1,), (1,)), ((), ())),
        preferred_element_type=jnp.float32)

    @pl.when(pl.program_id(2) == pl.num_programs(2) - 1)
    def _():
        y = acc_ref[...] + b_ref[...]
        if scale != 1.0:
            y = y * scale
        o_ref[...] = y.astype(o_ref.dtype)


def pallas_linear(x2d, w, b, *, scale=1.0, out_dtype=jnp.float32):
    """y = (x @ w.T + b) * scale  with torch Linear weight layout w: (N, K)."""
    M, K = x2d.shape
    N, K2 = w.shape
    assert K == K2 and b.shape == (N,)

    Mp, tm = _tile_and_pad(M, (512, 256, 128))
    Np, tn = _tile_and_pad(N, (512, 256, 128))
    Kp, tk = _tile_and_pad(K, (1024, 512, 256, 128))

    # pre-cast to bf16 in the wrapper: halves HBM->VMEM DMA bytes (the W tile
    # is re-fetched for every M step) and removes a VPU pack per grid step.
    xb = x2d.astype(jnp.bfloat16)
    wb = w.astype(jnp.bfloat16)
    bf = b.astype(jnp.float32)
    if (Mp, Kp) != (M, K):
        xb = jnp.pad(xb, ((0, Mp - M), (0, Kp - K)))
    if (Np, Kp) != (N, K):
        wb = jnp.pad(wb, ((0, Np - N), (0, Kp - K)))
    if Np != N:
        bf = jnp.pad(bf, (0, Np - N))
    bf = bf.reshape(1, Np)

    kernel = functools.partial(_linear_kernel, scale=float(scale))
    y = pl.pallas_call(
        kernel,
        out_shape=jax.ShapeDtypeStruct((Mp, Np), out_dtype),
        grid=(Mp // tm, Np // tn, Kp // tk),
        in_specs=[
            pl.BlockSpec((tm, tk), lambda i, j, kk: (i, kk)),
            pl.BlockSpec((tn, tk), lambda i, j, kk: (j, kk)),
            pl.BlockSpec((1, tn), lambda i, j, kk: (0, j)),
        ],
        out_specs=pl.BlockSpec((tm, tn), lambda i, j, kk: (i, j)),
        scratch_shapes=[pltpu.VMEM((tm, tn), jnp.float32)],
        compiler_params=pltpu.CompilerParams(
            dimension_semantics=("parallel", "parallel", "arbitrary"),
            vmem_limit_bytes=64 * 1024 * 1024),
    )(xb, wb, bf)
    if (Mp, Np) != (M, N):
        y = y[:M, :N]
    return y


# ----------------------------------------------------------------------------
# Kernel 2: scaled dot-product attention, one (batch, Lq-tile) per grid step.
# Heads are split in-kernel with static lane slices; q/k/v arrive full-width
# (B, L, d_model) bf16, q already scaled by 1/temperature.
# ----------------------------------------------------------------------------
def _sdpa_kernel(q_ref, k_ref, v_ref, m_ref, ctx_ref, attn_ref, *,
                 num_heads, d_k, d_v):
    q = q_ref[0]                        # (tq, H*d_k) bf16, pre-scaled
    k = k_ref[0]                        # (Lk, H*d_k) bf16
    v = v_ref[0]                        # (Lk, H*d_v) bf16
    mask = m_ref[0] != 0                # (tq, Lk) bool

    # Unrolled per-head loop (H is small and static): static lane slices of
    # the full-width blocks and per-head stores at static lane offsets - no
    # head-major relayout, no jnp.concatenate, no transposes.
    for h in range(num_heads):
        qh = q[:, h * d_k:(h + 1) * d_k]          # (tq, d_k)
        kh = k[:, h * d_k:(h + 1) * d_k]          # (Lk, d_k)
        vh = v[:, h * d_v:(h + 1) * d_v]          # (Lk, d_v)

        # QK^T on the MXU, f32 accumulation.
        s = lax.dot_general(qh, kh, (((1,), (1,)), ((), ())),
                            preferred_element_type=jnp.float32)   # (tq, Lk)
        s = jnp.where(mask, jnp.float32(-1000000000.0), s)

        # numerically stable softmax over keys in f32; EXACT normalization so
        # the returned attention rows sum to 1 (torch softmax parity).
        s = s - jnp.max(s, axis=-1, keepdims=True)
        e = jnp.exp(s)
        a = e / jnp.sum(e, axis=-1, keepdims=True)
        attn_ref[h, 0, :, :] = a.astype(attn_ref.dtype)   # torch (H,B,Lq,Lk) order

        # PV matmul; write this head directly at its static column offset of
        # the (tq, H*d_v) context block (matches torch's (B,Lq,H*d_v) layout).
        ctx_h = jnp.dot(a.astype(jnp.bfloat16), vh,
                        preferred_element_type=jnp.float32)       # (tq, d_v)
        ctx_ref[0, :, h * d_v:(h + 1) * d_v] = ctx_h.astype(ctx_ref.dtype)


def pallas_sdpa(qa, ka, va, mask_i8, num_heads, d_model, *,
                q_col=0, k_col=0, v_col=0, attn_dtype=jnp.float32):
    # qa/ka/va: (B, L, d_model) bf16, or all the SAME (B, L, 3*d_model) fused
    # QKV buffer with q_col/k_col/v_col selecting the column block.
    # mask_i8: (B, Lq, Lk) int8, single non-H-replicated copy.
    B, Lq = qa.shape[0], qa.shape[1]
    Lk = ka.shape[1]
    H = num_heads
    d_k = d_model // H
    d_v = d_model // H

    # Lq tile: 128-256 keeps the per-step footprint (double-buffered q/mask/
    # ctx/attn blocks + the f32 scores working set + full-Lk K/V blocks) well
    # under v7x's 64 MiB VMEM at Lk ~ 1-2k, while giving B * Lq/tq parallel
    # pipeline steps to balance across TensorCores.
    tq = Lq
    for c in (256, 128):
        if Lq % c == 0:
            tq = c
            break

    kernel = functools.partial(_sdpa_kernel, num_heads=H, d_k=d_k, d_v=d_v)
    ctx, attn = pl.pallas_call(
        kernel,
        out_shape=(
            jax.ShapeDtypeStruct((B, Lq, H * d_v), jnp.bfloat16),
            jax.ShapeDtypeStruct((H, B, Lq, Lk), attn_dtype),
        ),
        grid=(B, Lq // tq),
        in_specs=[
            pl.BlockSpec((1, tq, d_model), lambda b, qi: (b, qi, q_col)),
            pl.BlockSpec((1, Lk, d_model), lambda b, qi: (b, 0, k_col)),
            pl.BlockSpec((1, Lk, d_model), lambda b, qi: (b, 0, v_col)),
            pl.BlockSpec((1, tq, Lk), lambda b, qi: (b, qi, 0)),
        ],
        out_specs=[
            pl.BlockSpec((1, tq, H * d_v), lambda b, qi: (b, qi, 0)),
            pl.BlockSpec((H, 1, tq, Lk), lambda b, qi: (0, b, qi, 0)),
        ],
        compiler_params=pltpu.CompilerParams(
            dimension_semantics=("parallel", "parallel"),
            vmem_limit_bytes=64 * 1024 * 1024),
    )(qa, ka, va, mask_i8)
    return ctx, attn


# ----------------------------------------------------------------------------
# Full MultiHeadAttention forward
# ----------------------------------------------------------------------------
def multi_head_attention(params, q, k, v, mask=None):
    H = params["num_heads"]
    d_model = q.shape[-1]
    d_k = d_model // H
    d_v = d_k
    B, Lq, _ = q.shape
    _, Lk, _ = k.shape
    inv_temperature = 1.0 / math.sqrt(d_k)

    fuse_qkv = (q is k) and (k is v) and (d_model % 128 == 0)
    if fuse_qkv:
        # Self-attention fast path: one fused QKV matmul (x read from HBM once,
        # lane-dense 3*d_model output).  The 1/temperature scale is folded into
        # the Q weight/bias slice (O(d_model^2), hoistable / constant-foldable
        # when weights are static).  SDPA reads q/k/v column blocks straight
        # out of the fused buffer - no wrapper slices or copies.
        w_qkv = jnp.concatenate(
            [params["w_qs"] * inv_temperature, params["w_ks"], params["w_vs"]],
            axis=0)
        b_qkv = jnp.concatenate(
            [params["b_qs"] * inv_temperature, params["b_ks"], params["b_vs"]],
            axis=0)
        qkv = pallas_linear(q.reshape(B * Lq, d_model), w_qkv, b_qkv,
                            out_dtype=jnp.bfloat16).reshape(B, Lq, 3 * d_model)
        qa = ka = va = qkv
        cols = (0, 1, 2)
    else:
        # General (cross-attention capable) path: three lane-dense projections,
        # scale folded into the Q projection's store.
        qa = pallas_linear(q.reshape(B * Lq, d_model), params["w_qs"],
                           params["b_qs"], scale=inv_temperature,
                           out_dtype=jnp.bfloat16).reshape(B, Lq, d_model)
        ka = pallas_linear(k.reshape(B * Lk, d_model), params["w_ks"],
                           params["b_ks"],
                           out_dtype=jnp.bfloat16).reshape(B, Lk, d_model)
        va = pallas_linear(v.reshape(B * Lk, d_model), params["w_vs"],
                           params["b_vs"],
                           out_dtype=jnp.bfloat16).reshape(B, Lk, d_model)
        cols = (0, 0, 0)

    if mask is None:
        mask_i8 = jnp.zeros((B, Lq, Lk), dtype=jnp.int8)
    else:
        mask_i8 = mask.astype(jnp.int8)           # (B, Lq, Lk), single copy

    ctx, attn_hb = pallas_sdpa(qa, ka, va, mask_i8, H, d_model,
                               q_col=cols[0], k_col=cols[1], v_col=cols[2])

    # attn is already in torch's (H, B, Lq, Lk) ordering -> free reshape.
    attn = attn_hb.reshape(H * B, Lq, Lk)

    # ctx is already (B, Lq, H*d_v) -> free reshape into the tiled FC.
    out = pallas_linear(ctx.reshape(B * Lq, H * d_v),
                        params["w_fc"], params["b_fc"],
                        out_dtype=jnp.float32).reshape(B, Lq, d_model)
    # attention dropout and output dropout are identity (eval mode)
    return out, attn


# ----------------------------------------------------------------------------
# Pure-JAX (f32) reference for verification
# ----------------------------------------------------------------------------
def reference_mha(params, q, k, v, mask=None):
    d_model = q.shape[-1]
    H = params["num_heads"]
    d_k = d_model // H
    d_v = d_k
    B, Lq, _ = q.shape
    _, Lk, _ = k.shape
    temperature = math.sqrt(d_k)

    qp = q @ params["w_qs"].T + params["b_qs"]
    kp = k @ params["w_ks"].T + params["b_ks"]
    vp = v @ params["w_vs"].T + params["b_vs"]
    qh = qp.reshape(B, Lq, H, d_k).transpose(2, 0, 1, 3).reshape(H * B, Lq, d_k)
    kh = kp.reshape(B, Lk, H, d_k).transpose(2, 0, 1, 3).reshape(H * B, Lk, d_k)
    vh = vp.reshape(B, Lk, H, d_v).transpose(2, 0, 1, 3).reshape(H * B, Lk, d_v)

    attn = jnp.einsum("bqd,bkd->bqk", qh, kh) / temperature
    if mask is not None:
        mask_rep = jnp.tile(mask.astype(bool), (H, 1, 1))
        attn = jnp.where(mask_rep, -1000000000.0, attn)
    attn = jax.nn.softmax(attn, axis=2)
    out_h = jnp.einsum("bqk,bkd->bqd", attn, vh)
    out = out_h.reshape(H, B, Lq, d_v).transpose(1, 2, 0, 3).reshape(B, Lq, H * d_v)
    out = out @ params["w_fc"].T + params["b_fc"]
    return out, attn


def make_params(key, d_model, num_heads):
    d_k = d_model // num_heads
    keys = jax.random.split(key, 4)
    std_proj = math.sqrt(2.0 / (d_model + d_k))
    std_fc = math.sqrt(2.0 / (d_model + d_model))   # xavier_normal for fc
    return {
        "num_heads": num_heads,
        "w_qs": std_proj * jax.random.normal(keys[0], (num_heads * d_k, d_model), jnp.float32),
        "b_qs": jnp.zeros((num_heads * d_k,), jnp.float32),
        "w_ks": std_proj * jax.random.normal(keys[1], (num_heads * d_k, d_model), jnp.float32),
        "b_ks": jnp.zeros((num_heads * d_k,), jnp.float32),
        "w_vs": std_proj * jax.random.normal(keys[2], (num_heads * d_k, d_model), jnp.float32),
        "b_vs": jnp.zeros((num_heads * d_k,), jnp.float32),
        "w_fc": std_fc * jax.random.normal(keys[3], (d_model, num_heads * d_k), jnp.float32),
        "b_fc": jnp.zeros((d_model,), jnp.float32),
    }


# ----------------------------------------------------------------------------
# Main
# ----------------------------------------------------------------------------
if __name__ == "__main__":
    key = jax.random.PRNGKey(0)
    k_par, k_q, k_k, k_v, k_par2, k_x = jax.random.split(key, 6)

    # ---- Test 1: cross-attention style (distinct q/k/v), with padding mask --
    B, L, d_model, num_heads = 2, 8, 32, 4
    params = make_params(k_par, d_model, num_heads)
    q = jax.random.normal(k_q, (B, L, d_model), jnp.float32)
    k = jax.random.normal(k_k, (B, L, d_model), jnp.float32)
    v = jax.random.normal(k_v, (B, L, d_model), jnp.float32)

    # deterministic padding-style mask: mask the last 2 key positions of batch 1
    key_valid = jnp.arange(L)[None, :] < jnp.array([L, L - 2])[:, None]    # (B, Lk)
    mask = jnp.broadcast_to(~key_valid[:, None, :], (B, L, L))             # (B, Lq, Lk)

    out, attn = multi_head_attention(params, q, k, v, mask=mask)
    out = jax.block_until_ready(out)
    attn = jax.block_until_ready(attn)
    out_ref, attn_ref = reference_mha(params, q, k, v, mask=mask)

    assert out.shape == (B, L, d_model)
    assert attn.shape == (num_heads * B, L, L)
    # bf16 MXU operands (f32 accumulation) bound the accuracy vs the f32 reference.
    assert jnp.allclose(attn, attn_ref, atol=3e-2, rtol=3e-2), "attn mismatch (separate path)"
    assert jnp.allclose(out, out_ref, atol=1e-1, rtol=1e-1), "output mismatch (separate path)"

    # ---- Test 2: self-attention (q is k is v), fused QKV fast path ----------
    B2, L2, dm2, H2 = 2, 8, 128, 4
    params2 = make_params(k_par2, dm2, H2)
    x = jax.random.normal(k_x, (B2, L2, dm2), jnp.float32)

    out2, attn2 = multi_head_attention(params2, x, x, x, mask=None)
    out2 = jax.block_until_ready(out2)
    attn2 = jax.block_until_ready(attn2)
    out2_ref, attn2_ref = reference_mha(params2, x, x, x, mask=None)

    assert out2.shape == (B2, L2, dm2)
    assert attn2.shape == (H2 * B2, L2, L2)
    assert jnp.allclose(attn2, attn2_ref, atol=3e-2, rtol=3e-2), "attn mismatch (fused path)"
    assert jnp.allclose(out2, out2_ref, atol=1e-1, rtol=1e-1), "output mismatch (fused path)"

    print("KERNEL_OK")
</pallas_src>

<mosaic_0001>
module attributes {stable_mosaic.version = 11 : i64} {
  func.func @_linear_kernel(%arg0: i32, %arg1: i32, %arg2: i32, %arg3: memref<16x32xbf16, #tpu.memory_space<vmem>>, %arg4: memref<32x32xbf16, #tpu.memory_space<vmem>>, %arg5: memref<1x32xf32, #tpu.memory_space<vmem>>, %arg6: memref<16x32xbf16, #tpu.memory_space<vmem>>, %arg7: memref<16x32xf32, #tpu.memory_space<vmem>>) attributes {dimension_semantics = [#tpu.dimension_semantics<parallel>, #tpu.dimension_semantics<parallel>, #tpu.dimension_semantics<arbitrary>], iteration_bounds = array<i64: 1, 1, 1>, scalar_prefetch = 0 : i64, scratch_operands = 1 : i64, tpu.core_type = #tpu.core_type<tc>, window_params = [{transform_indices = @transform_0, window_bounds = array<i64: 16, 32>}, {transform_indices = @transform_1, window_bounds = array<i64: 32, 32>}, {transform_indices = @transform_2, window_bounds = array<i64: 1, 32>}, {transform_indices = @transform_3, window_bounds = array<i64: 16, 32>}]} {
    %c0_i32 = arith.constant 0 : i32
    %0 = arith.cmpi eq, %arg2, %c0_i32 : i32
    %1 = arith.extui %0 : i1 to i32
    %c0_i32_0 = arith.constant 0 : i32
    %2 = arith.cmpi ne, %1, %c0_i32_0 : i32
    scf.if %2 {
      %cst_10 = arith.constant 0.000000e+00 : f32
      %12 = vector.broadcast %cst_10 : f32 to vector<16x32xf32>
      %c0_11 = arith.constant 0 : index
      %c0_12 = arith.constant 0 : index
      %13 = vector.load %arg7[%c0_11, %c0_12] : memref<16x32xf32, #tpu.memory_space<vmem>>, vector<16x32xf32>
      tpu.vector_store %arg7[%c0_11, %c0_12], %12 {strides = array<i32>} : memref<16x32xf32, #tpu.memory_space<vmem>>, vector<16x32xf32>,
    } else {
    }
    %c0 = arith.constant 0 : index
    %c0_1 = arith.constant 0 : index
    %3 = vector.load %arg7[%c0, %c0_1] : memref<16x32xf32, #tpu.memory_space<vmem>>, vector<16x32xf32>
    %c0_2 = arith.constant 0 : index
    %c0_3 = arith.constant 0 : index
    %4 = vector.load %arg3[%c0_2, %c0_3] : memref<16x32xbf16, #tpu.memory_space<vmem>>, vector<16x32xbf16>
    %c0_4 = arith.constant 0 : index
    %c0_5 = arith.constant 0 : index
    %5 = vector.load %arg4[%c0_4, %c0_5] : memref<32x32xbf16, #tpu.memory_space<vmem>>, vector<32x32xbf16>
    %cst = arith.constant dense<0.000000e+00> : vector<16x32xf32>
    %6 = tpu.matmul %4, %5, %cst {dimension_numbers = #tpu.dot_dimension_numbers<[1], [1], [0], [0], [0, 0, 1, 0], [], []>} : vector<16x32xbf16>, vector<32x32xbf16>, vector<16x32xf32> -> vector<16x32xf32>
    %7 = arith.addf %3, %6 : vector<16x32xf32>
    %c0_6 = arith.constant 0 : index
    %c0_7 = arith.constant 0 : index
    %8 = vector.load %arg7[%c0_6, %c0_7] : memref<16x32xf32, #tpu.memory_space<vmem>>, vector<16x32xf32>
    tpu.vector_store %arg7[%c0_6, %c0_7], %7 {strides = array<i32>} : memref<16x32xf32, #tpu.memory_space<vmem>>, vector<16x32xf32>,
    %c0_i32_8 = arith.constant 0 : i32
    %9 = arith.cmpi eq, %arg2, %c0_i32_8 : i32
    %10 = arith.extui %9 : i1 to i32
    %c0_i32_9 = arith.constant 0 : i32
    %11 = arith.cmpi ne, %10, %c0_i32_9 : i32
    scf.if %11 {
      %c0_10 = arith.constant 0 : index
      %c0_11 = arith.constant 0 : index
      %12 = vector.load %arg7[%c0_10, %c0_11] : memref<16x32xf32, #tpu.memory_space<vmem>>, vector<16x32xf32>
      %c0_12 = arith.constant 0 : index
      %c0_13 = arith.constant 0 : index
      %13 = vector.load %arg5[%c0_12, %c0_13] : memref<1x32xf32, #tpu.memory_space<vmem>>, vector<1x32xf32>
      %14 = vector.broadcast %13 : vector<1x32xf32> to vector<16x32xf32>
      %15 = arith.addf %12, %14 : vector<16x32xf32>
      %cst_14 = arith.constant 0.353553385 : f32
      %16 = vector.broadcast %cst_14 : f32 to vector<16x32xf32>
      %17 = arith.mulf %15, %16 : vector<16x32xf32>
      %18 = arith.truncf %17 : vector<16x32xf32> to vector<16x32xbf16>
      %c0_15 = arith.constant 0 : index
      %c0_16 = arith.constant 0 : index
      %19 = vector.load %arg6[%c0_15, %c0_16] : memref<16x32xbf16, #tpu.memory_space<vmem>>, vector<16x32xbf16>
      tpu.vector_store %arg6[%c0_15, %c0_16], %18 {strides = array<i32>} : memref<16x32xbf16, #tpu.memory_space<vmem>>, vector<16x32xbf16>,
    } else {
    }
    return
  }
  func.func @transform_0(%arg0: i32, %arg1: i32, %arg2: i32) -> (i32, i32) {
    %c0_i32 = arith.constant 0 : i32
    return %arg0, %arg2 : i32, i32
  }
  func.func @transform_1(%arg0: i32, %arg1: i32, %arg2: i32) -> (i32, i32) {
    %c0_i32 = arith.constant 0 : i32
    return %arg1, %arg2 : i32, i32
  }
  func.func @transform_2(%arg0: i32, %arg1: i32, %arg2: i32) -> (i32, i32) {
    %c0_i32 = arith.constant 0 : i32
    %c0_i32_0 = arith.constant 0 : i32
    return %c0_i32, %arg1 : i32, i32
  }
  func.func @transform_3(%arg0: i32, %arg1: i32, %arg2: i32) -> (i32, i32) {
    %c0_i32 = arith.constant 0 : i32
    return %arg0, %arg1 : i32, i32
  }
}

</mosaic_0001>

<bundles_post_ra>
// kernel: tpu_custom_call.1
= control target key start
LH: loop header
LB: loop body
LE: loop exit
PB: predicated region body
PF: predicated region fallthrough
CT: control target
= control target key end

     0   :  { %8 = vsyncpa [#allocation4], 0  ;;  %s325_s0 = inlined_call_operand.hbm [shape: bf16[16,32], index: 0, kind: input, shape index: {}]   ;;  %s326_s1 = inlined_call_operand.hbm [shape: bf16[32,32], index: 1, kind: input, shape index: {}]   ;;  %s327_s2 = inlined_call_operand.vmem [shape: f32[1,32], index: 2, kind: input, shape index: {}]   ;;  %s328_s3 = inlined_call_operand.hbm [shape: bf16[16,32], index: 3, kind: output, shape index: {}]  }
   0x1   :  { %9 = vsyncpa [#allocation7], 0 }
   0x2   :  { %10 = vsyncpa [#allocation5], 0  ;;  %s270_s12 = smov [#allocation3]  }
   0x3   :  { %s16_s13 = sshll.u32 %s270_s12, 4  ;;  %s17_s13 = int_to_ptr.vmem [resolvable:$true] %s16_s13 }
   0x4   :  { %s212_s14 = scalar_lea.vmem %s17_s13, 128  ;;  %p217_p1 = scmp.lt.s32.totalorder %s17_s13, %s17_s13 }
   0x5   :  { %p213_p0 = scmp.ne.s32.totalorder %s17_s13, %s212_s14  ;;  %p218_p2 = scmp.lt.s32.totalorder %s212_s14, %s212_s14 }
   0x7   :  { %p219_p3 = por %p218_p2, %p217_p1 }
   0x9   :  { %p220_p4 = pnand %p219_p3, %p213_p0 }
   0xb   :  { %223 = shalt.err (!%p220_p4)
}
   0xc   :  { %s271_s15 = smov 64   ;;  %s272_s16 = smov 4  }
   0xd   :  { %22 = dma.hbm_to_vmem [thread:$0]  %s325_s0, 128, %s17_s13, [#allocation4], %s271_s15, %s271_s15, %s272_s16  }
   0xe   :  { %s273_s19 = smov [#allocation6]  }
   0xf   :  { %s28_s20 = sshll.u32 %s273_s19, 4  ;;  %s29_s20 = int_to_ptr.vmem [resolvable:$true] %s28_s20 }
  0x10   :  { %s232_s21 = scalar_lea.vmem %s29_s20, 256  ;;  %p237_p6 = scmp.lt.s32.totalorder %s29_s20, %s29_s20 }
  0x11   :  { %p233_p5 = scmp.ne.s32.totalorder %s29_s20, %s232_s21  ;;  %p238_p7 = scmp.lt.s32.totalorder %s232_s21, %s232_s21 }
  0x13   :  { %p239_p8 = por %p238_p7, %p237_p6 }
  0x15   :  { %p240_p9 = pnand %p239_p8, %p233_p5 }
  0x17   :  { %243 = shalt.err (!%p240_p9)
}
  0x18   :  { %34 = dma.hbm_to_vmem [thread:$0]  %s326_s1, 256, %s29_s20, [#allocation7], %s271_s15, %s271_s15, %s272_s16  }
  0x19   :  { %264 = dma.done.wait [#allocation4], 128  }
  0x1a   :  { %265 = vsyncadd [#allocation4], 4294967168 }
  0x1b   :  { %266 = dma.done.wait [#allocation7], 256  }
  0x1c   :  { %267 = vsyncadd [#allocation7], 4294967040  ;;  %vm48_vm0 = vcmask 261120   ;;  %v274_v0 = vmov 0.0   ;;  %vm275_vm1 = vmmov 0   ;;  %v201_v1 = vld [vmem:[#allocation6 + $0x8] sm:$0xff]  }
  0x1d   :  { %49 = vst.msk [vmem:[#allocation2] sm:$0xff] %vm48_vm0, %v274_v0  ;;  %50 = vst.msk [vmem:[#allocation2 + $0x8] sm:$0xff] %vm48_vm0, %v274_v0  ;;  %186 = vmatprep.subr.bf16.mxu0 %v274_v0  ;;  %190 = vmatprep.mubr.msk.bf16.mxu0 %vm275_vm1, %v274_v0  ;;  %v82_v2 = vsel %vm48_vm0, %v201_v1, 0  ;;  %v202_v3 = vld [vmem:[#allocation6] sm:$0xff]   ;;  %v203_v5 = vld [vmem:[#allocation3] sm:$0xff]   ;;  %vm153_vm2 = vcmask 257024  }
  0x1e   :  { %187 = vmatpush3.bf16.xpose.msra.mxu0 %v82_v2  ;;  %v79_v4 = vsel %vm48_vm0, %v202_v3, 0  ;;  %v178_v14 = vld [vmem:[%s327_s2] ss:$0 sm:$0xff]  ;;  %s276_s24 = smov [#allocation8]  }
  0x1f   :  { %188 = vmatprep.subr.bf16.mxu0 %v274_v0  ;;  %s161_s25 = sshll.u32 %s276_s24, 4  ;;  %s162_s25 = int_to_ptr.vmem [resolvable:$true] %s161_s25 }
  0x20   :  { %s244_s26 = scalar_lea.vmem %s162_s25, 128  ;;  %p249_p11 = scmp.lt.s32.totalorder %s162_s25, %s162_s25 }
  0x21   :  { %p245_p10 = scmp.ne.s32.totalorder %s162_s25, %s244_s26  ;;  %p250_p12 = scmp.lt.s32.totalorder %s244_s26, %s244_s26 }
  0x23   :  { %p251_p13 = por %p250_p12, %p249_p11 }
  0x24   :  { %v51_v6 = vld [vmem:[#allocation2] sm:$0xff]  ;;  %v52_v10 = vld [vmem:[#allocation2 + $0x8] sm:$0xff] }
  0x25   :  { %p252_p0 = pnand %p251_p13, %p245_p10 }
  0x26   :  { %189 = vmatpush3.bf16.xpose.msra.mxu0 %v79_v4 }
  0x2d   :  { %191 = vmatmul.mubr.msk.bf16.vlgmr.msra.gmra.mxu0 %vm48_vm0, %v203_v5 }
  0xed   :  { %v118_v7 = vpop.f32.mrf.mxu0 }
  0xee   :  { %v125_v8 = vadd.f32 %v118_v7, %v51_v6 }
  0xef   :  { %v192_v9 = vpop.f32.mrf.mxu0 }
  0xf0   :  { %127 = vst.msk [vmem:[#allocation2] sm:$0xff] %vm48_vm0, %v125_v8 }
  0xf1   :  { %v121_v11 = vpop.f32.mrf.mxu0 }
  0xf2   :  { %v126_v12 = vadd.f32 %v121_v11, %v52_v10 }
  0xf3   :  { %v193_v13 = vpop.f32.mrf.mxu0 }
  0xf4   :  { %128 = vst.msk [vmem:[#allocation2 + $0x8] sm:$0xff] %vm48_vm0, %v126_v12 }
  0xf7   :  { %v132_v15 = vld [vmem:[#allocation2] sm:$0xff] }
  0xf8   :  { %v141_v16 = vadd.f32 %v178_v14, %v132_v15 }
  0xfa   :  { %v143_v17 = vmul.f32 0.35355338, %v141_v16 }
  0xfb   :  { %v133_v18 = vld [vmem:[#allocation2 + $0x8] sm:$0xff] }
  0xfc   :  { %v142_v19 = vadd.f32 %v178_v14, %v133_v18  ;;  %v181_v20 = vpack.c.bf16 %v143_v17, %v143_v17 }
  0xfe   :  { %v144_v21 = vmul.f32 0.35355338, %v142_v19  ;;  %154 = vst.msk [vmem:[#allocation8] sm:$0xf] %vm153_vm2, %v181_v20 }
 0x100   :  { %v182_v22 = vpack.c.bf16 %v144_v21, %v144_v21 }
 0x102   :  { %155 = vst.msk [vmem:[#allocation8 + $0x4] sm:$0xf] %vm153_vm2, %v182_v22 }
 0x103   :  { %255 = shalt.err (!%p252_p0)
}
 0x104   :  { %167 = dma.vmem_to_hbm [thread:$0]  %s162_s25, 128, %s328_s3, [#allocation5], %s271_s15, %s271_s15, %s272_s16  }
 0x105   :  { %268 = dma.done.wait [#allocation5], 128  }
 0x106   :  { %269 = vsyncadd [#allocation5], 4294967168 }
 0x107   :  { %171 = vsyncpa [#allocation4], 1 }
 0x108   :  { %172 = vsyncpa [#allocation7], 1 }
 0x109   :  { %173 = vsyncpa [#allocation5], 1 }

</bundles_post_ra>
